<compile_context>
chip_gen: v5e
topology: v5e:2x2
jax: 0.10.0
libtpu: 0.0.40
codegen_flags: <defaults>
</compile_context>

<pallas_src>
import functools
import math

import jax
import jax.numpy as jnp
from jax.experimental import pallas as pl
from jax.experimental.pallas import tpu as pltpu

BBOX_XFORM_CLIP = math.log(1000.0 / 16.0)
TO_REMOVE = 1.0


def _postprocess_kernel(logits_ref, reg_ref, row_ref,
                        prob_ref, box_ref, keep_ref,
                        *, inv_wx, inv_wy, inv_ww, inv_wh, score_thresh):
    # ---- softmax over classes (lane axis) ----
    logits = logits_ref[...]
    m = jnp.max(logits, axis=-1, keepdims=True)
    e = jnp.exp(logits - m)
    denom = jnp.sum(e, axis=-1, keepdims=True)
    prob = e * pl.reciprocal(denom, approx=False)      # exact recip: 1-2 ulp vs divide
    prob_ref[...] = prob

    # ---- score threshold mask (filter_results: scores > score_thresh) ----
    keep_ref[...] = (prob > score_thresh).astype(jnp.int8)

    # ---- precomputed per-row geometry (TILE_N, 1) columns ----
    widths  = row_ref[:, 0:1]
    heights = row_ref[:, 1:2]
    ctr_x   = row_ref[:, 2:3]
    ctr_y   = row_ref[:, 3:4]
    max_x   = row_ref[:, 4:5]
    max_y   = row_ref[:, 5:6]
    half_w0 = row_ref[:, 6:7]    # 0.5 * widths  (precomputed -> one less VPU mul/elem)
    half_h0 = row_ref[:, 7:8]    # 0.5 * heights

    # ---- BoxCoder.decode (weights as reciprocal multiplies) ----
    dx = reg_ref[0] * inv_wx                       # (TILE_N, C)
    dy = reg_ref[1] * inv_wy
    dw = jnp.minimum(reg_ref[2] * inv_ww, BBOX_XFORM_CLIP)
    dh = jnp.minimum(reg_ref[3] * inv_wh, BBOX_XFORM_CLIP)

    pred_ctr_x = dx * widths + ctr_x
    pred_ctr_y = dy * heights + ctr_y
    half_w = jnp.exp(dw) * half_w0
    half_h = jnp.exp(dh) * half_h0

    # ---- clip_to_image(remove_empty=False); plane-major box output ----
    box_ref[0] = jnp.clip(pred_ctr_x - half_w, 0.0, max_x)          # x1
    box_ref[1] = jnp.clip(pred_ctr_y - half_h, 0.0, max_y)          # y1
    box_ref[2] = jnp.clip(pred_ctr_x + half_w - 1.0, 0.0, max_x)    # x2
    box_ref[3] = jnp.clip(pred_ctr_y + half_h - 1.0, 0.0, max_y)    # y2


def postprocessor_forward(class_logits, box_regression, concat_boxes, imwh,
                          score_thresh=0.05, bbox_weights=(10.0, 10.0, 5.0, 5.0),
                          max_tile_n=2048, vmem_block_budget_bytes=12 * 1024 * 1024):
    """Dense part of PostProcessor.forward for all images concatenated.

    class_logits:   (N, C) float32
    box_regression: (N, 4*C) float32   (class-specific regression, torch layout)
    concat_boxes:   (N, 4) float32     xyxy proposals
    imwh:           (N, 2) float32     per-row (image_width, image_height)

    Returns:
      class_prob: (N, C) float32
      boxes:      (4, N, C) float32   plane-major: boxes[0]=x1, [1]=y1, [2]=x2, [3]=y2
      keep:       (N, C) int8         (scores > score_thresh) mask
    """
    N, C = class_logits.shape
    assert box_regression.shape == (N, 4 * C)
    wx, wy, ww, wh = bbox_weights

    class_logits = class_logits.astype(jnp.float32)

    # (N,4C) -> (N,C,4) is a free reshape; the single transpose to plane-major (4,N,C)
    # is left for XLA to fuse into the pallas_call input pipeline (allow_input_fusion).
    reg4 = jnp.transpose(box_regression.astype(jnp.float32).reshape(N, C, 4), (2, 0, 1))

    # --- per-row geometry precomputed once into one small (N, 8) stream ---
    widths = concat_boxes[:, 2] - concat_boxes[:, 0] + TO_REMOVE
    heights = concat_boxes[:, 3] - concat_boxes[:, 1] + TO_REMOVE
    ctr_x = concat_boxes[:, 0] + 0.5 * widths
    ctr_y = concat_boxes[:, 1] + 0.5 * heights
    max_x = imwh[:, 0] - TO_REMOVE
    max_y = imwh[:, 1] - TO_REMOVE
    rowdat = jnp.stack([widths, heights, ctr_x, ctr_y, max_x, max_y,
                        0.5 * widths, 0.5 * heights], axis=1).astype(jnp.float32)

    # --- tile_n from a double-buffered VMEM byte budget; no padding, cdiv grid ---
    bytes_per_row = 41 * C + 32          # logits+reg+prob+boxes (f32) + keep (i8) + rowdat
    budget_rows = int(vmem_block_budget_bytes // (2 * bytes_per_row))
    cap = max(32, min(int(max_tile_n), (budget_rows // 32) * 32))
    tile_n = int(N) if N <= cap else cap   # full-dim block when N is small
    grid = (pl.cdiv(N, tile_n),)

    kernel = functools.partial(
        _postprocess_kernel,
        inv_wx=1.0 / wx, inv_wy=1.0 / wy, inv_ww=1.0 / ww, inv_wh=1.0 / wh,
        score_thresh=score_thresh)

    spec_nc = pl.BlockSpec((tile_n, C), lambda i: (i, 0))
    spec_reg = pl.BlockSpec((4, tile_n, C), lambda i: (0, i, 0))
    spec_row = pl.BlockSpec((tile_n, 8), lambda i: (i, 0))

    prob, boxes, keep = pl.pallas_call(
        kernel,
        out_shape=(
            jax.ShapeDtypeStruct((N, C), jnp.float32),      # prob
            jax.ShapeDtypeStruct((4, N, C), jnp.float32),   # boxes (plane-major)
            jax.ShapeDtypeStruct((N, C), jnp.int8),         # keep mask
        ),
        grid=grid,
        in_specs=[spec_nc, spec_reg, spec_row],
        out_specs=(spec_nc, spec_reg, spec_nc),
        compiler_params=pltpu.CompilerParams(
            dimension_semantics=("parallel",),
            vmem_limit_bytes=32 * 1024 * 1024,
            allow_input_fusion=[True, True, True],
        ),
    )(class_logits, reg4, rowdat)

    return prob, boxes, keep


# ---------------- pure-JAX reference for validation ----------------
def _reference(class_logits, box_regression, concat_boxes, imwh,
               score_thresh=0.05, bbox_weights=(10.0, 10.0, 5.0, 5.0)):
    N, C = class_logits.shape
    prob = jax.nn.softmax(class_logits, axis=-1)
    widths = concat_boxes[:, 2] - concat_boxes[:, 0] + TO_REMOVE
    heights = concat_boxes[:, 3] - concat_boxes[:, 1] + TO_REMOVE
    ctr_x = concat_boxes[:, 0] + 0.5 * widths
    ctr_y = concat_boxes[:, 1] + 0.5 * heights
    wx, wy, ww, wh = bbox_weights
    reg = box_regression.reshape(N, C, 4)
    dx = reg[..., 0] / wx
    dy = reg[..., 1] / wy
    dw = jnp.minimum(reg[..., 2] / ww, BBOX_XFORM_CLIP)
    dh = jnp.minimum(reg[..., 3] / wh, BBOX_XFORM_CLIP)
    pcx = dx * widths[:, None] + ctr_x[:, None]
    pcy = dy * heights[:, None] + ctr_y[:, None]
    pw = jnp.exp(dw) * widths[:, None]
    ph = jnp.exp(dh) * heights[:, None]
    x1 = pcx - 0.5 * pw
    y1 = pcy - 0.5 * ph
    x2 = pcx + 0.5 * pw - 1.0
    y2 = pcy + 0.5 * ph - 1.0
    mx = imwh[:, 0:1] - TO_REMOVE
    my = imwh[:, 1:2] - TO_REMOVE
    x1 = jnp.clip(x1, 0.0, mx); x2 = jnp.clip(x2, 0.0, mx)
    y1 = jnp.clip(y1, 0.0, my); y2 = jnp.clip(y2, 0.0, my)
    boxes_out = jnp.stack([x1, y1, x2, y2], axis=0)           # (4, N, C) plane-major
    keep = (prob > score_thresh).astype(jnp.int8)
    return prob, boxes_out, keep


if __name__ == "__main__":
    key = jax.random.PRNGKey(0)
    # two images, 8 proposals each; C=81 classes (incl. background) -> Nx324 regression
    boxes_per_image = [8, 8]
    image_shapes = [(64.0, 48.0), (80.0, 60.0)]  # (width, height) per image
    N = sum(boxes_per_image)
    C = 81

    k1, k2, k3, k4 = jax.random.split(key, 4)
    class_logits = jax.random.normal(k1, (N, C), dtype=jnp.float32)
    box_regression = 0.5 * jax.random.normal(k2, (N, 4 * C), dtype=jnp.float32)

    # well-formed xyxy proposals inside each image
    xy = jax.random.uniform(k3, (N, 2), dtype=jnp.float32, minval=0.0, maxval=30.0)
    wh = jax.random.uniform(k4, (N, 2), dtype=jnp.float32, minval=4.0, maxval=20.0)
    concat_boxes = jnp.concatenate([xy, xy + wh], axis=1)

    # per-row (image_width, image_height), replicating the per-image split
    imwh = jnp.concatenate(
        [jnp.tile(jnp.asarray(s, dtype=jnp.float32)[None, :], (n, 1))
         for s, n in zip(image_shapes, boxes_per_image)], axis=0)

    prob, dec_boxes, keep = postprocessor_forward(
        class_logits, box_regression, concat_boxes, imwh)
    jax.block_until_ready((prob, dec_boxes, keep))

    ref_prob, ref_boxes, ref_keep = _reference(
        class_logits, box_regression, concat_boxes, imwh)

    assert jnp.allclose(prob, ref_prob, atol=1e-5, rtol=1e-5)
    assert jnp.allclose(dec_boxes, ref_boxes, atol=1e-3, rtol=1e-4)
    assert jnp.array_equal(keep, ref_keep)

    print("KERNEL_OK")
</pallas_src>

<mosaic_0001>
module attributes {stable_mosaic.version = 11 : i64} {
  func.func @_postprocess_kernel(%arg0: i32, %arg1: memref<16x81xf32, #tpu.memory_space<vmem>>, %arg2: memref<4x16x81xf32, #tpu.memory_space<vmem>>, %arg3: memref<16x8xf32, #tpu.memory_space<vmem>>, %arg4: memref<16x81xf32, #tpu.memory_space<vmem>>, %arg5: memref<4x16x81xf32, #tpu.memory_space<vmem>>, %arg6: memref<16x81xi8, #tpu.memory_space<vmem>>) attributes {dimension_semantics = [#tpu.dimension_semantics<parallel>], iteration_bounds = array<i64: 1>, scalar_prefetch = 0 : i64, scratch_operands = 0 : i64, tpu.core_type = #tpu.core_type<tc>, window_params = [{transform_indices = @transform_0, window_bounds = array<i64: 16, 81>}, {transform_indices = @transform_1, window_bounds = array<i64: 4, 16, 81>}, {transform_indices = @transform_2, window_bounds = array<i64: 16, 8>}, {transform_indices = @transform_3, window_bounds = array<i64: 16, 81>}, {transform_indices = @transform_4, window_bounds = array<i64: 4, 16, 81>}, {transform_indices = @transform_5, window_bounds = array<i64: 16, 81>}]} {
    %c0 = arith.constant 0 : index
    %c0_0 = arith.constant 0 : index
    %0 = vector.load %arg1[%c0, %c0_0] : memref<16x81xf32, #tpu.memory_space<vmem>>, vector<16x81xf32>
    %cst = arith.constant dense<0xFF800000> : vector<16xf32>
    %1 = vector.multi_reduction <maximumf>, %0, %cst [1] : vector<16x81xf32> to vector<16xf32>
    %2 = vector.shape_cast %1 : vector<16xf32> to vector<16x1xf32>
    %3 = vector.broadcast %2 : vector<16x1xf32> to vector<16x81xf32>
    %4 = arith.subf %0, %3 : vector<16x81xf32>
    %5 = math.exp %4 : vector<16x81xf32>
    %cst_1 = arith.constant dense<0.000000e+00> : vector<16xf32>
    %6 = vector.multi_reduction <add>, %5, %cst_1 [1] : vector<16x81xf32> to vector<16xf32>
    %7 = vector.shape_cast %6 : vector<16xf32> to vector<16x1xf32>
    %8 = tpu.reciprocal %7 : vector<16x1xf32> -> vector<16x1xf32>
    %9 = vector.broadcast %8 : vector<16x1xf32> to vector<16x81xf32>
    %10 = arith.mulf %5, %9 : vector<16x81xf32>
    %c0_2 = arith.constant 0 : index
    %c0_3 = arith.constant 0 : index
    %11 = vector.load %arg4[%c0_2, %c0_3] : memref<16x81xf32, #tpu.memory_space<vmem>>, vector<16x81xf32>
    tpu.vector_store %arg4[%c0_2, %c0_3], %10 {strides = array<i32>} : memref<16x81xf32, #tpu.memory_space<vmem>>, vector<16x81xf32>,
    %cst_4 = arith.constant 5.000000e-02 : f32
    %12 = vector.broadcast %cst_4 : f32 to vector<16x81xf32>
    %13 = arith.cmpf ogt, %10, %12 : vector<16x81xf32>
    %14 = arith.extui %13 : vector<16x81xi1> to vector<16x81xi8>
    %c0_5 = arith.constant 0 : index
    %c0_6 = arith.constant 0 : index
    %15 = vector.load %arg6[%c0_5, %c0_6] : memref<16x81xi8, #tpu.memory_space<vmem>>, vector<16x81xi8>
    tpu.vector_store %arg6[%c0_5, %c0_6], %14 {strides = array<i32>} : memref<16x81xi8, #tpu.memory_space<vmem>>, vector<16x81xi8>,
    %c0_7 = arith.constant 0 : index
    %c0_8 = arith.constant 0 : index
    %16 = vector.load %arg3[%c0_7, %c0_8] : memref<16x8xf32, #tpu.memory_space<vmem>>, vector<16x1xf32>
    %c0_9 = arith.constant 0 : index
    %c1 = arith.constant 1 : index
    %17 = vector.load %arg3[%c0_9, %c1] : memref<16x8xf32, #tpu.memory_space<vmem>>, vector<16x1xf32>
    %c0_10 = arith.constant 0 : index
    %c2 = arith.constant 2 : index
    %18 = vector.load %arg3[%c0_10, %c2] : memref<16x8xf32, #tpu.memory_space<vmem>>, vector<16x1xf32>
    %c0_11 = arith.constant 0 : index
    %c3 = arith.constant 3 : index
    %19 = vector.load %arg3[%c0_11, %c3] : memref<16x8xf32, #tpu.memory_space<vmem>>, vector<16x1xf32>
    %c0_12 = arith.constant 0 : index
    %c4 = arith.constant 4 : index
    %20 = vector.load %arg3[%c0_12, %c4] : memref<16x8xf32, #tpu.memory_space<vmem>>, vector<16x1xf32>
    %c0_13 = arith.constant 0 : index
    %c5 = arith.constant 5 : index
    %21 = vector.load %arg3[%c0_13, %c5] : memref<16x8xf32, #tpu.memory_space<vmem>>, vector<16x1xf32>
    %c0_14 = arith.constant 0 : index
    %c6 = arith.constant 6 : index
    %22 = vector.load %arg3[%c0_14, %c6] : memref<16x8xf32, #tpu.memory_space<vmem>>, vector<16x1xf32>
    %c0_15 = arith.constant 0 : index
    %c7 = arith.constant 7 : index
    %23 = vector.load %arg3[%c0_15, %c7] : memref<16x8xf32, #tpu.memory_space<vmem>>, vector<16x1xf32>
    %c0_16 = arith.constant 0 : index
    %c0_17 = arith.constant 0 : index
    %c0_18 = arith.constant 0 : index
    %24 = vector.load %arg2[%c0_16, %c0_17, %c0_18] : memref<4x16x81xf32, #tpu.memory_space<vmem>>, vector<1x16x81xf32>
    %25 = vector.shape_cast %24 : vector<1x16x81xf32> to vector<16x81xf32>
    %cst_19 = arith.constant 1.000000e-01 : f32
    %26 = vector.broadcast %cst_19 : f32 to vector<16x81xf32>
    %27 = arith.mulf %25, %26 : vector<16x81xf32>
    %c1_20 = arith.constant 1 : index
    %c0_21 = arith.constant 0 : index
    %c0_22 = arith.constant 0 : index
    %28 = vector.load %arg2[%c1_20, %c0_21, %c0_22] : memref<4x16x81xf32, #tpu.memory_space<vmem>>, vector<1x16x81xf32>
    %29 = vector.shape_cast %28 : vector<1x16x81xf32> to vector<16x81xf32>
    %cst_23 = arith.constant 1.000000e-01 : f32
    %30 = vector.broadcast %cst_23 : f32 to vector<16x81xf32>
    %31 = arith.mulf %29, %30 : vector<16x81xf32>
    %c2_24 = arith.constant 2 : index
    %c0_25 = arith.constant 0 : index
    %c0_26 = arith.constant 0 : index
    %32 = vector.load %arg2[%c2_24, %c0_25, %c0_26] : memref<4x16x81xf32, #tpu.memory_space<vmem>>, vector<1x16x81xf32>
    %33 = vector.shape_cast %32 : vector<1x16x81xf32> to vector<16x81xf32>
    %cst_27 = arith.constant 2.000000e-01 : f32
    %34 = vector.broadcast %cst_27 : f32 to vector<16x81xf32>
    %35 = arith.mulf %33, %34 : vector<16x81xf32>
    %cst_28 = arith.constant 4.13516665 : f32
    %36 = vector.broadcast %cst_28 : f32 to vector<16x81xf32>
    %37 = arith.minimumf %35, %36 : vector<16x81xf32>
    %c3_29 = arith.constant 3 : index
    %c0_30 = arith.constant 0 : index
    %c0_31 = arith.constant 0 : index
    %38 = vector.load %arg2[%c3_29, %c0_30, %c0_31] : memref<4x16x81xf32, #tpu.memory_space<vmem>>, vector<1x16x81xf32>
    %39 = vector.shape_cast %38 : vector<1x16x81xf32> to vector<16x81xf32>
    %cst_32 = arith.constant 2.000000e-01 : f32
    %40 = vector.broadcast %cst_32 : f32 to vector<16x81xf32>
    %41 = arith.mulf %39, %40 : vector<16x81xf32>
    %cst_33 = arith.constant 4.13516665 : f32
    %42 = vector.broadcast %cst_33 : f32 to vector<16x81xf32>
    %43 = arith.minimumf %41, %42 : vector<16x81xf32>
    %44 = vector.broadcast %16 : vector<16x1xf32> to vector<16x81xf32>
    %45 = arith.mulf %27, %44 : vector<16x81xf32>
    %46 = vector.broadcast %18 : vector<16x1xf32> to vector<16x81xf32>
    %47 = arith.addf %45, %46 : vector<16x81xf32>
    %48 = vector.broadcast %17 : vector<16x1xf32> to vector<16x81xf32>
    %49 = arith.mulf %31, %48 : vector<16x81xf32>
    %50 = vector.broadcast %19 : vector<16x1xf32> to vector<16x81xf32>
    %51 = arith.addf %49, %50 : vector<16x81xf32>
    %52 = math.exp %37 : vector<16x81xf32>
    %53 = vector.broadcast %22 : vector<16x1xf32> to vector<16x81xf32>
    %54 = arith.mulf %52, %53 : vector<16x81xf32>
    %55 = math.exp %43 : vector<16x81xf32>
    %56 = vector.broadcast %23 : vector<16x1xf32> to vector<16x81xf32>
    %57 = arith.mulf %55, %56 : vector<16x81xf32>
    %58 = arith.subf %47, %54 : vector<16x81xf32>
    %cst_34 = arith.constant 0.000000e+00 : f32
    %59 = vector.broadcast %cst_34 : f32 to vector<16x81xf32>
    %60 = arith.maximumf %59, %58 : vector<16x81xf32>
    %61 = vector.broadcast %20 : vector<16x1xf32> to vector<16x81xf32>
    %62 = arith.minimumf %61, %60 : vector<16x81xf32>
    %c0_35 = arith.constant 0 : index
    %c0_36 = arith.constant 0 : index
    %c0_37 = arith.constant 0 : index
    %63 = vector.load %arg5[%c0_35, %c0_36, %c0_37] : memref<4x16x81xf32, #tpu.memory_space<vmem>>, vector<1x16x81xf32>
    %64 = vector.shape_cast %63 : vector<1x16x81xf32> to vector<16x81xf32>
    %65 = vector.shape_cast %62 : vector<16x81xf32> to vector<1x16x81xf32>
    tpu.vector_store %arg5[%c0_35, %c0_36, %c0_37], %65 {strides = array<i32>} : memref<4x16x81xf32, #tpu.memory_space<vmem>>, vector<1x16x81xf32>,
    %66 = arith.subf %51, %57 : vector<16x81xf32>
    %cst_38 = arith.constant 0.000000e+00 : f32
    %67 = vector.broadcast %cst_38 : f32 to vector<16x81xf32>
    %68 = arith.maximumf %67, %66 : vector<16x81xf32>
    %69 = vector.broadcast %21 : vector<16x1xf32> to vector<16x81xf32>
    %70 = arith.minimumf %69, %68 : vector<16x81xf32>
    %c1_39 = arith.constant 1 : index
    %c0_40 = arith.constant 0 : index
    %c0_41 = arith.constant 0 : index
    %71 = vector.load %arg5[%c1_39, %c0_40, %c0_41] : memref<4x16x81xf32, #tpu.memory_space<vmem>>, vector<1x16x81xf32>
    %72 = vector.shape_cast %71 : vector<1x16x81xf32> to vector<16x81xf32>
    %73 = vector.shape_cast %70 : vector<16x81xf32> to vector<1x16x81xf32>
    tpu.vector_store %arg5[%c1_39, %c0_40, %c0_41], %73 {strides = array<i32>} : memref<4x16x81xf32, #tpu.memory_space<vmem>>, vector<1x16x81xf32>,
    %74 = arith.addf %47, %54 : vector<16x81xf32>
    %cst_42 = arith.constant 1.000000e+00 : f32
    %75 = vector.broadcast %cst_42 : f32 to vector<16x81xf32>
    %76 = arith.subf %74, %75 : vector<16x81xf32>
    %cst_43 = arith.constant 0.000000e+00 : f32
    %77 = vector.broadcast %cst_43 : f32 to vector<16x81xf32>
    %78 = arith.maximumf %77, %76 : vector<16x81xf32>
    %79 = vector.broadcast %20 : vector<16x1xf32> to vector<16x81xf32>
    %80 = arith.minimumf %79, %78 : vector<16x81xf32>
    %c2_44 = arith.constant 2 : index
    %c0_45 = arith.constant 0 : index
    %c0_46 = arith.constant 0 : index
    %81 = vector.load %arg5[%c2_44, %c0_45, %c0_46] : memref<4x16x81xf32, #tpu.memory_space<vmem>>, vector<1x16x81xf32>
    %82 = vector.shape_cast %81 : vector<1x16x81xf32> to vector<16x81xf32>
    %83 = vector.shape_cast %80 : vector<16x81xf32> to vector<1x16x81xf32>
    tpu.vector_store %arg5[%c2_44, %c0_45, %c0_46], %83 {strides = array<i32>} : memref<4x16x81xf32, #tpu.memory_space<vmem>>, vector<1x16x81xf32>,
    %84 = arith.addf %51, %57 : vector<16x81xf32>
    %cst_47 = arith.constant 1.000000e+00 : f32
    %85 = vector.broadcast %cst_47 : f32 to vector<16x81xf32>
    %86 = arith.subf %84, %85 : vector<16x81xf32>
    %cst_48 = arith.constant 0.000000e+00 : f32
    %87 = vector.broadcast %cst_48 : f32 to vector<16x81xf32>
    %88 = arith.maximumf %87, %86 : vector<16x81xf32>
    %89 = vector.broadcast %21 : vector<16x1xf32> to vector<16x81xf32>
    %90 = arith.minimumf %89, %88 : vector<16x81xf32>
    %c3_49 = arith.constant 3 : index
    %c0_50 = arith.constant 0 : index
    %c0_51 = arith.constant 0 : index
    %91 = vector.load %arg5[%c3_49, %c0_50, %c0_51] : memref<4x16x81xf32, #tpu.memory_space<vmem>>, vector<1x16x81xf32>
    %92 = vector.shape_cast %91 : vector<1x16x81xf32> to vector<16x81xf32>
    %93 = vector.shape_cast %90 : vector<16x81xf32> to vector<1x16x81xf32>
    tpu.vector_store %arg5[%c3_49, %c0_50, %c0_51], %93 {strides = array<i32>} : memref<4x16x81xf32, #tpu.memory_space<vmem>>, vector<1x16x81xf32>,
    return
  }
  func.func @transform_0(%arg0: i32) -> (i32, i32) {
    %c0_i32 = arith.constant 0 : i32
    %c0_i32_0 = arith.constant 0 : i32
    return %arg0, %c0_i32 : i32, i32
  }
  func.func @transform_1(%arg0: i32) -> (i32, i32, i32) {
    %c0_i32 = arith.constant 0 : i32
    %c0_i32_0 = arith.constant 0 : i32
    %c0_i32_1 = arith.constant 0 : i32
    return %c0_i32, %arg0, %c0_i32_0 : i32, i32, i32
  }
  func.func @transform_2(%arg0: i32) -> (i32, i32) {
    %c0_i32 = arith.constant 0 : i32
    %c0_i32_0 = arith.constant 0 : i32
    return %arg0, %c0_i32 : i32, i32
  }
  func.func @transform_3(%arg0: i32) -> (i32, i32) {
    %c0_i32 = arith.constant 0 : i32
    %c0_i32_0 = arith.constant 0 : i32
    return %arg0, %c0_i32 : i32, i32
  }
  func.func @transform_4(%arg0: i32) -> (i32, i32, i32) {
    %c0_i32 = arith.constant 0 : i32
    %c0_i32_0 = arith.constant 0 : i32
    %c0_i32_1 = arith.constant 0 : i32
    return %c0_i32, %arg0, %c0_i32_0 : i32, i32, i32
  }
  func.func @transform_5(%arg0: i32) -> (i32, i32) {
    %c0_i32 = arith.constant 0 : i32
    %c0_i32_0 = arith.constant 0 : i32
    return %arg0, %c0_i32 : i32, i32
  }
}

</mosaic_0001>

<bundles_post_ra>
// kernel: tpu_custom_call.1
= control target key start
LH: loop header
LB: loop body
LE: loop exit
PB: predicated region body
PF: predicated region fallthrough
CT: control target
= control target key end

     0   :  { %11 = vsyncpa [#allocation3], 0  ;;  %s581_s0 = inlined_call_operand.vmem [shape: f32[16,81], index: 0, kind: input, shape index: {}]   ;;  %s582_s1 = inlined_call_operand.hbm [shape: f32[4,16,81], index: 1, kind: input, shape index: {}]   ;;  %s583_s2 = inlined_call_operand.vmem [shape: f32[16,8], index: 2, kind: input, shape index: {}]   ;;  %s584_s3 = inlined_call_operand.hbm [shape: f32[16,81], index: 3, kind: output, shape index: {0}]   ;;  %s585_s4 = inlined_call_operand.hbm [shape: f32[4,16,81], index: 4, kind: output, shape index: {1}]   ;;  %s586_s5 = inlined_call_operand.hbm [shape: s8[16,81], index: 5, kind: output, shape index: {2}]  }
   0x1   :  { %12 = vsyncpa [#allocation4], 0 }
   0x2   :  { %13 = vsyncpa [#allocation7], 0  ;;  %s20_s20 = sshll.u32 %s582_s1, 4  ;;  %s463_s21 = smov [#allocation2]   ;;  %s21_s20 = int_to_ptr.hbm [resolvable:$true] %s20_s20 }
   0x3   :  { %s22_s22 = sshll.u32 %s463_s21, 4  ;;  %s464_s23 = smov 128   ;;  %s23_s22 = int_to_ptr.vmem [resolvable:$true] %s22_s22 }
   0x4   :  { %s465_s24 = smov 8  }
   0x5   :  { %28 = dma.hbm_to_vmem [thread:$0]  %s21_s20, 1024, %s23_s22, [#allocation3], %s464_s23, %s464_s23, %s465_s24  }
   0x6   :  { %457 = dma.done.wait [#allocation3], 1024  }
   0x7   :  { %458 = vsyncadd [#allocation3], 4294966272  ;;  %v466_v0 = vmov 0   ;;  %v467_v1 = vmov 2   ;;  %vm39_vm0 = vcmask 662528   ;;  %v37_v2 = vld [vmem:[%s581_s0] sm:$0xff] }
   0x8   :  { %331 = vset.pattern.permute.xlu2 %v466_v0  ;;  %333 = vset.pattern.permute.xlu1 %v467_v1  ;;  %v107_v3 = vld [vmem:[%s583_s2] sm:$0xff]  ;;  %v40_v4 = vsel %vm39_vm0, %v37_v2, -inf  ;;  %v526_v5 = vld [vmem:[%s583_s2 + $0x8] sm:$0xff]  ;;  %v468_v8 = vmov 6   ;;  %v469_v9 = vmov 1   ;;  %v470_v10 = vmov 7  }
   0x9   :  { %332 = vset.pattern.permute.xlu0 %v467_v1  ;;  %134 = vperm.xlu2 %331, %v107_v3   ;;  %v38_v6 = vld [vmem:[%s581_s0 + $0x8] sm:$0xff]  ;;  %v471_v11 = vmov 4   ;;  %v472_v12 = vmov 3   ;;  %v473_v13 = vmov 5   ;;  %v115_v23 = vld [vmem:[#allocation2 + $0x18] sm:$0xff]  ;;  %v119_v32 = vld [vmem:[#allocation2 + $0x20] sm:$0xff] }
   0xa   :  { %41 = vmax.xlane.f32.xlu0 %v40_v4  ;;  %149 = vperm.xlu1 %333, %v526_v5   ;;  %v43_v7 = vsel %vm39_vm0, %v38_v6, -inf  ;;  %v117_v28 = vmul.f32 0.1, %v115_v23  ;;  %v110_v30 = vld [vmem:[#allocation2 + $0x8] sm:$0xff]  ;;  %v126_v34 = vld [vmem:[#allocation2 + $0x30] sm:$0xff]  ;;  %v109_v41 = vld [vmem:[#allocation2] sm:$0xff] }
   0xb   :  { %v120_v31 = vld [vmem:[#allocation2 + $0x28] sm:$0xff]  ;;  %v121_v37 = vmul.f32 0.2, %v119_v32  ;;  %v128_v38 = vmul.f32 0.2, %v126_v34  ;;  %v114_v42 = vld [vmem:[#allocation2 + $0x10] sm:$0xff] }
   0xc   :  { %v122_v35 = vmul.f32 0.2, %v120_v31  ;;  %v112_v39 = vmul.f32 0.1, %v110_v30  ;;  %v111_v51 = vmul.f32 0.1, %v109_v41 }
   0xd   :  { %v123_v43 = vmin.f32 %v121_v37, 4.1351666  ;;  %v130_v44 = vmin.f32 %v128_v38, 4.1351666  ;;  %v116_v53 = vmul.f32 0.1, %v114_v42 }
   0xe   :  { %v124_v40 = vmin.f32 %v122_v35, 4.1351666  ;;  %v127_v32 = vld [vmem:[#allocation2 + $0x38] sm:$0xff]  ;;  %s474_s0 = smov [#allocation5]   ;;  %s263_s9 = sshll.u32 %s584_s3, 4  ;;  %vm104_vm13 = vcmask 656384   ;;  %s264_s9 = int_to_ptr.hbm [resolvable:$true] %s263_s9 }
   0xf   :  { %v174_v48 = vmul.f32 1.442695, %v123_v43  ;;  %v188_v50 = vmul.f32 1.442695, %v130_v44  ;;  %s261_s2 = sshll.u32 %s474_s0, 4  ;;  %s475_s3 = smov [#allocation6]   ;;  %s262_s2 = int_to_ptr.vmem [resolvable:$true] %s261_s2 }
  0x10   :  { %v176_v46 = vmul.f32 1.442695, %v124_v40  ;;  %s274_s10 = sshll.u32 %s475_s3, 4  ;;  %s276_s13 = sshll.u32 %s585_s4, 4  ;;  %s275_s10 = int_to_ptr.vmem [resolvable:$true] %s274_s10  ;;  %s277_s13 = int_to_ptr.hbm [resolvable:$true] %s276_s13 }
  0x11   :  { %139 = vperm.xlu2 %331, %v526_v5   ;;  %s476_s14 = smov [#allocation8]   ;;  %s289_s4 = sshll.u32 %s586_s5, 4  ;;  %s290_s4 = int_to_ptr.hbm [resolvable:$true] %s289_s4 }
  0x12   :  { %44 = vmax.xlane.f32.xlu0 %v43_v7  ;;  %336 = vset.pattern.permute.xlu1 %v468_v8  ;;  %s287_s15 = sshll.u32 %s476_s14, 4  ;;  %s477_s18 = smov 32   ;;  %s288_s15 = int_to_ptr.vmem [resolvable:$true] %s287_s15 }
  0x13   :  { %179 = vperm.xlu1 %336, %v107_v3   ;;  %s478_s19 = smov 2  }
  0x19   :  { %334 = vset.pattern.permute.xlu2 %v469_v9 }
  0x1a   :  { %155 = vperm.xlu2 %334, %v107_v3  }
  0x1b   :  { %338 = vset.pattern.permute.xlu1 %v470_v10 }
  0x1c   :  { %193 = vperm.xlu1 %338, %v107_v3  }
  0x22   :  { %159 = vperm.xlu2 %334, %v526_v5  }
  0x24   :  { %341 = vset.pattern.permute.xlu1 %v471_v11 }
  0x25   :  { %211 = vperm.xlu1 %341, %v526_v5  }
  0x26   :  { %145 = vperm.xlu0 %332, %v107_v3  }
  0x2a   :  { %335 = vset.pattern.permute.xlu2 %v472_v12 }
  0x2b   :  { %165 = vperm.xlu2 %335, %v107_v3  }
  0x2d   :  { %343 = vset.pattern.permute.xlu1 %v473_v13 }
  0x2e   :  { %339 = vset.pattern.permute.xlu0 %v470_v10 }
  0x2f   :  { %197 = vperm.xlu0 %339, %v526_v5  }
  0x33   :  { %169 = vperm.xlu2 %335, %v526_v5  }
  0x37   :  { %344 = vset.pattern.permute.xlu0 %v473_v13 }
  0x3b   :  { %337 = vset.pattern.permute.xlu2 %v468_v8 }
  0x3c   :  { %183 = vperm.xlu2 %337, %v526_v5  }
  0x44   :  { %340 = vset.pattern.permute.xlu2 %v471_v11 }
  0x45   :  { %207 = vperm.xlu2 %340, %v107_v3  }
  0x4d   :  { %342 = vset.pattern.permute.xlu2 %v473_v13 }
  0x4e   :  { %223 = vperm.xlu2 %342, %v107_v3  }
  0x63   :  { %v135_v14 = vpop.permute.xlu2 %134 }
  0x64   :  { %v142_v56 = vmul.f32 %v135_v14, %v111_v51 }
  0x6b   :  { %v140_v15 = vpop.permute.xlu2 %139 }
  0x6c   :  { %v143_v54 = vmul.f32 %v140_v15, %v112_v39 }
  0x74   :  { %v156_v16 = vpop.permute.xlu2 %155 }
  0x75   :  { %v162_v57 = vmul.f32 %v156_v16, %v116_v53 }
  0x7c   :  { %v160_v19 = vpop.permute.xlu2 %159  ;;  %v150_v21 = vpop.permute.xlu1 %149 }
  0x7d   :  { %v42_v17 = vpop.xlane.xlu0 %41  ;;  %v163_v36 = vmul.f32 %v160_v19, %v117_v28  ;;  %v153_v58 = vadd.f32 %v150_v21, %v143_v54 }
  0x7e   :  { %v46_v18 = vsub.f32 %v37_v2, %v42_v17 }
  0x80   :  { %v48_v20 = vmul.f32 1.442695, %v46_v18 }
  0x82   :  { %345 = vpow2.f32 %v48_v20 }
  0x85   :  { %v45_v22 = vpop.xlane.xlu0 %44  ;;  %v166_v25 = vpop.permute.xlu2 %165 }
  0x86   :  { %v47_v24 = vsub.f32 %v38_v6, %v45_v22  ;;  %v180_v33 = vpop.permute.xlu1 %179  ;;  %v172_v2 = vadd.f32 %v166_v25, %v162_v57 }
  0x88   :  { %v539_v26 = vpop.eup %345  ;;  %v50_v27 = vmul.f32 1.442695, %v47_v24 }
  0x89   :  { %v52_v29 = vsel %vm39_vm0, %v539_v26, 0.0 }
  0x8a   :  { %347 = vpow2.f32 %v50_v27  ;;  %53 = vadd.xlane.f32.xlu1 %v52_v29 }
  0x8b   :  { %349 = vpow2.f32 %v176_v46 }
  0x8c   :  { %351 = vpow2.f32 %v174_v48 }
  0x8d   :  { %v170_v45 = vpop.permute.xlu2 %169  ;;  %353 = vpow2.f32 %v188_v50 }
  0x8e   :  { %v545_v49 = vadd.f32 %v170_v45, %v163_v36  ;;  %v194_v55 = vpop.permute.xlu1 %193 }
  0x90   :  { %v543_v47 = vpop.eup %347 }
  0x91   :  { %v55_v52 = vsel %vm39_vm0, %v543_v47, 0.0  ;;  %v350_v59 = vpop.eup %349 }
  0x92   :  { %56 = vadd.xlane.f32.xlu1 %v55_v52  ;;  %v352_v61 = vpop.eup %351 }
  0x93   :  { %v354_v1 = vpop.eup %353  ;;  %v186_v3 = vmul.f32 %v352_v61, %v180_v33  ;;  %v129_v33 = vmul.f32 0.2, %v127_v32 }
  0x94   :  { %v200_v6 = vmul.f32 %v354_v1, %v194_v55 }
  0x95   :  { %v131_v35 = vmin.f32 %v129_v33, 4.1351666 }
  0x96   :  { %v184_v60 = vpop.permute.xlu2 %183  ;;  %v246_v14 = vadd.f32 %v200_v6, %v172_v2  ;;  %v218_v23 = vsub.f32 %v172_v2, %v200_v6 }
  0x97   :  { %v187_v62 = vmul.f32 %v350_v59, %v184_v60  ;;  %v212_v9 = vpop.permute.xlu1 %211  ;;  %v190_v36 = vmul.f32 1.442695, %v131_v35 }
  0x98   :  { %v146_v63 = vpop.permute.xlu0 %145  ;;  %v313_v25 = vadd.f32 -1.0, %v246_v14  ;;  %v220_v27 = vmax.f32 %v218_v23, 0.0 }
  0x99   :  { %v152_v4 = vadd.f32 %v146_v63, %v142_v56  ;;  %v203_v7 = vsub.f32 %v153_v58, %v187_v62  ;;  %v236_v8 = vadd.f32 %v187_v62, %v153_v58 }
  0x9a   :  { %v250_v28 = vmax.f32 %v313_v25, 0.0 }
  0x9b   :  { %v202_v10 = vsub.f32 %v152_v4, %v186_v3  ;;  %v235_v11 = vadd.f32 %v186_v3, %v152_v4  ;;  %v205_v12 = vmax.f32 %v203_v7, 0.0  ;;  %v312_v13 = vadd.f32 -1.0, %v236_v8 }
  0x9d   :  { %v204_v15 = vmax.f32 %v202_v10, 0.0  ;;  %v311_v16 = vadd.f32 -1.0, %v235_v11  ;;  %v240_v17 = vmax.f32 %v312_v13, 0.0  ;;  %v215_v18 = vmin.f32 %v212_v9, %v205_v12 }
  0x9f   :  { %v239_v19 = vmax.f32 %v311_v16, 0.0  ;;  %v208_v20 = vpop.permute.xlu2 %207  ;;  %217 = vst.msk [vmem:[#allocation6 + $0x8] sm:$0xff] %vm39_vm0, %v215_v18  ;;  %v242_v21 = vmin.f32 %v212_v9, %v240_v17 }
  0xa0   :  { %v214_v22 = vmin.f32 %v208_v20, %v204_v15 }
  0xa1   :  { %v241_v24 = vmin.f32 %v208_v20, %v239_v19  ;;  %245 = vst.msk [vmem:[#allocation6 + $0x28] sm:$0xff] %vm39_vm0, %v242_v21  ;;  %v198_v48 = vpop.permute.xlu0 %197 }
  0xa2   :  { %216 = vst.msk [vmem:[#allocation6] sm:$0xff] %vm39_vm0, %v214_v22 }
  0xa3   :  { %244 = vst.msk [vmem:[#allocation6 + $0x20] sm:$0xff] %vm39_vm0, %v241_v24 }
  0xa8   :  { %v224_v29 = vpop.permute.xlu2 %223 }
  0xa9   :  { %v230_v30 = vmin.f32 %v224_v29, %v220_v27  ;;  %v252_v31 = vmin.f32 %v224_v29, %v250_v28 }
  0xab   :  { %227 = vperm.xlu1 %343, %v526_v5   ;;  %233 = vst.msk [vmem:[#allocation6 + $0x10] sm:$0xff] %vm39_vm0, %v230_v30 }
  0xac   :  { %255 = vst.msk [vmem:[#allocation6 + $0x30] sm:$0xff] %vm39_vm0, %v252_v31 }
  0xfd   :  { %v54_v34 = vpop.xlane.xlu1 %53 }
  0xfe   :  { %355 = vrcp.f32 %v54_v34  ;;  %v69_v41 = vand.u32 2147483648, %v54_v34  ;;  %v67_v5 = vand.u32 2147483647, %v54_v34  ;;  %vm63_vm2 = vweird.f32 %v54_v34 }
 0x100   :  { %v70_v45 = vor.u32 1.1754944e-38, %v69_v41  ;;  %vm68_vm4 = vcmp.eq.f32.partialorder %v67_v5, 8.507059e+37 }
 0x104   :  { %v356_v37 = vpop.eup %355 }
 0x105   :  { %v59_v38 = vmul.f32 %v356_v37, %v54_v34  ;;  %v57_v39 = vpop.xlane.xlu1 %56  ;;  %vm64_vm1 = vweird.f32 %v356_v37 }
 0x106   :  { %357 = vrcp.f32 %v57_v39  ;;  %vm65_vm3 = vmor %vm63_vm2, %vm64_vm1  ;;  %v83_v56 = vand.u32 2147483648, %v57_v39  ;;  %v81_v58 = vand.u32 2147483647, %v57_v39  ;;  %vm77_vm6 = vweird.f32 %v57_v39 }
 0x107   :  { %359 = vpow2.f32 %v190_v36  ;;  %v60_v40 = vsub.f32 1.0, %v59_v38 }
 0x108   :  { %v84_v61 = vor.u32 1.1754944e-38, %v83_v56  ;;  %vm82_vm8 = vcmp.eq.f32.partialorder %v81_v58, 8.507059e+37 }
 0x109   :  { %v61_v42 = vmul.f32 %v356_v37, %v60_v40 }
 0x10b   :  { %v62_v43 = vadd.f32 %v356_v37, %v61_v42 }
 0x10c   :  { %v358_v44 = vpop.eup %357 }
 0x10d   :  { %v360_v46 = vpop.eup %359  ;;  %v66_v50 = vsel %vm65_vm3, %v356_v37, %v62_v43  ;;  %v73_v51 = vmul.f32 %v358_v44, %v57_v39  ;;  %vm78_vm5 = vweird.f32 %v358_v44 }
 0x10e   :  { %v71_v52 = vsel %vm68_vm4, %v70_v45, %v66_v50  ;;  %v201_v55 = vmul.f32 %v360_v46, %v198_v48  ;;  %vm79_vm7 = vmor %vm77_vm6, %vm78_vm5 }
 0x10f   :  { %v74_v53 = vsub.f32 1.0, %v73_v51  ;;  %v86_v54 = vmul.f32 %v539_v26, %v71_v52 }
 0x110   :  { %v247_v60 = vadd.f32 %v201_v55, %v545_v49  ;;  %v219_v1 = vsub.f32 %v545_v49, %v201_v55 }
 0x111   :  { %v75_v57 = vmul.f32 %v358_v44, %v74_v53  ;;  %88 = vst.msk [vmem:[#allocation5] sm:$0xff] %vm39_vm0, %v86_v54  ;;  %vm90_vm9 = vcmp.gt.f32.partialorder %v86_v54, 0.05 }
 0x112   :  { %v314_v2 = vadd.f32 -1.0, %v247_v60  ;;  %v221_v4 = vmax.f32 %v219_v1, 0.0 }
 0x113   :  { %v76_v59 = vadd.f32 %v358_v44, %v75_v57 }
 0x114   :  { %v251_v6 = vmax.f32 %v314_v2, 0.0 }
 0x115   :  { %v80_v26 = vsel %vm79_vm7, %v358_v44, %v76_v59 }
 0x116   :  { %v85_v62 = vsel %vm82_vm8, %v84_v61, %v80_v26 }
 0x117   :  { %v87_v63 = vmul.f32 %v543_v47, %v85_v62 }
 0x119   :  { %89 = vst.msk [vmem:[#allocation5 + $0x8] sm:$0xff] %vm39_vm0, %v87_v63  ;;  %vm91_vm10 = vcmp.gt.f32.partialorder %v87_v63, 0.05 }
 0x11a   :  { %vm92_vm11 = vmpackc.low %vm91_vm10, %vm90_vm9  ;;  %269 = dma.vmem_to_hbm [thread:$0]  %s262_s2, 256, %s264_s9, [#allocation4], %s464_s23, %s464_s23, %s465_s24  }
 0x11b   :  { %v93_v3 = vsel %vm92_vm11, 16711935, %v466_v0 }
 0x11c   :  { %v95_v47 = vpack.c.b8 %v93_v3, %v93_v3 }
 0x11d   :  { %v228_v49 = vpop.permute.xlu1 %227 }
 0x11e   :  { %v231_v7 = vmin.f32 %v228_v49, %v221_v4  ;;  %v253_v8 = vmin.f32 %v228_v49, %v251_v6  ;;  %vm96_vm12 = vnez %v95_v47 }
 0x11f   :  { %v97_v9 = vsel %vm96_vm12, 16843009, %v466_v0 }
 0x120   :  { %234 = vst.msk [vmem:[#allocation6 + $0x18] sm:$0xff] %vm39_vm0, %v231_v7  ;;  %v98_v10 = vunpack.c.0.s8 %v97_v9  ;;  %v99_v11 = vunpack.c.1.s8 %v97_v9 }
 0x121   :  { %256 = vst.msk [vmem:[#allocation6 + $0x38] sm:$0xff] %vm39_vm0, %v253_v8 }
 0x122   :  { %282 = dma.vmem_to_hbm [thread:$0]  %s275_s10, 1024, %s277_s13, [#allocation7], %s464_s23, %s464_s23, %s465_s24   ;;  %v100_v12 = vpack.c.b16 %v98_v10, %v98_v10  ;;  %v102_v13 = vpack.c.b16 %v99_v11, %v99_v11 }
 0x124   :  { %v101_v0 = vpack.c.b8 %v100_v12, %v100_v12  ;;  %v103_v14 = vpack.c.b8 %v102_v13, %v102_v13 }
 0x126   :  { %105 = vst.msk [vmem:[#allocation8] sm:$0x3] %vm104_vm13, %v101_v0 }
 0x127   :  { %106 = vst.msk [vmem:[#allocation8 + $0x2] sm:$0x3] %vm104_vm13, %v103_v14 }
 0x128   :  { %295 = dma.vmem_to_hbm [thread:$0]  %s288_s15, 64, %s290_s4, [#allocation7], %s477_s18, %s477_s18, %s478_s19  }
 0x129   :  { %459 = dma.done.wait [#allocation4], 256  }
 0x12a   :  { %460 = vsyncadd [#allocation4], 4294967040 }
 0x12b   :  { %461 = dma.done.wait [#allocation7], 1088  }
 0x12c   :  { %462 = vsyncadd [#allocation7], 4294966208 }
 0x12d   :  { %308 = vsyncpa [#allocation3], 1 }
 0x12e   :  { %309 = vsyncpa [#allocation4], 1 }
 0x12f   :  { %310 = vsyncpa [#allocation7], 1 }

</bundles_post_ra>
